<compile_context>
chip_gen: v5e
topology: v5e:2x2
jax: 0.10.0
libtpu: 0.0.40
codegen_flags: <defaults>
</compile_context>

<pallas_src>
import jax
import jax.numpy as jnp
import numpy as np
from jax.experimental import pallas as pl
from jax.experimental.pallas import tpu as pltpu

_INV_SQRT2 = 0.7071067811865476
_SQRT_2_OVER_PI = 0.7978845608028654
_GN_EPS = 1e-5


def _gelu(h, approximate):
    if approximate:
        # tanh-approx GELU runs on the EUP (its own bundle slot) instead of a long
        # erf VPU polynomial. Off by default to keep exact parity with nn.GELU.
        return 0.5 * h * (1.0 + jnp.tanh(_SQRT_2_OVER_PI * (h + 0.044715 * h * h * h)))
    # PyTorch nn.GELU / F.gelu default: exact erf formulation.
    return 0.5 * h * (1.0 + jax.lax.erf(h * _INV_SQRT2))


# --------------------------------------------------------------------------------------
# Kernel
# --------------------------------------------------------------------------------------
def _make_double_conv_kernel(residual, b_tile, l_per_sample, compute_dtype, approx_gelu):
    f32 = jnp.float32
    bl = b_tile * l_per_sample

    def kernel(x_ref, w1_ref, w2_ref, p_ref, aux_ref, o_ref):
        aux = aux_ref[...]                                # (b_tile + 2, BL) f32, static
        m_seg = aux[0:b_tile, :]                          # 0/1 sample membership
        mask_l = aux[b_tile:b_tile + 1, :] != 0.0         # column has a left neighbour
        mask_r = aux[b_tile + 1:b_tile + 2, :] != 0.0     # column has a right neighbour

        p = p_ref[...]                                    # (C_out, 6) f32
        b1, g1, be1 = p[:, 0:1], p[:, 1:2], p[:, 2:3]
        b2, g2, be2 = p[:, 3:4], p[:, 4:5], p[:, 5:6]
        c_out = p.shape[0]
        inv_n = 1.0 / (c_out * l_per_sample)

        def conv3(h_cd, w_ref, bias):
            # 3-tap conv (padding=1) as three accumulated MXU dots on rolled/masked
            # copies; pltpu.roll is an XLU lane rotation (no concatenate VMEM copy).
            left = jnp.where(mask_l, pltpu.roll(h_cd, 1, axis=1), 0)        # x[l-1]
            right = jnp.where(mask_r, pltpu.roll(h_cd, bl - 1, axis=1), 0)  # x[l+1]
            y = jnp.dot(w_ref[1], h_cd, preferred_element_type=f32)
            y = y + jnp.dot(w_ref[0], left, preferred_element_type=f32)
            y = y + jnp.dot(w_ref[2], right, preferred_element_type=f32)
            return y + bias

        def groupnorm(h, gamma, beta):
            # GroupNorm(num_groups=1): per-sample stats over (C, L) in one pass;
            # one stats dot + one broadcast dot against the 0/1 segment matrix.
            colsum = jnp.sum(h, axis=0, keepdims=True)                 # (1, BL)
            colsq = jnp.sum(h * h, axis=0, keepdims=True)              # (1, BL)
            stats = jnp.concatenate([colsum, colsq], axis=0)           # (2, BL)
            dims = (((1,), (1,)), ((), ()))                            # contract lanes
            s = jax.lax.dot_general(stats, m_seg, dims,
                                    preferred_element_type=f32) * inv_n  # (2, b_tile)
            mu, ex2 = s[0:1, :], s[1:2, :]
            inv_std = jax.lax.rsqrt(ex2 - mu * mu + _GN_EPS)
            coef = jnp.concatenate([-mu * inv_std, inv_std], axis=0)     # (2, b_tile)
            coef_c = jnp.dot(coef, m_seg, preferred_element_type=f32)    # (2, BL)
            shift_c, scale_c = coef_c[0:1, :], coef_c[1:2, :]
            return (h * scale_c + shift_c) * gamma + beta

        x_in = x_ref[...]
        # Single cast into the MXU dtype per conv (no f32 round-trip of stacked taps).
        h1 = _gelu(groupnorm(conv3(x_in.astype(compute_dtype), w1_ref, b1), g1, be1),
                   approx_gelu)
        out = groupnorm(conv3(h1.astype(compute_dtype), w2_ref, b2), g2, be2)
        if residual:
            out = _gelu(x_in.astype(f32) + out, approx_gelu)
        o_ref[...] = out.astype(o_ref.dtype)

    return kernel


# --------------------------------------------------------------------------------------
# Blocking / VMEM budgeting
# --------------------------------------------------------------------------------------
def _round_up(x, m):
    return int(np.ceil(x / m)) * m


def _vmem_budget_bytes():
    # Generation-aware budget: v7x has 64 MiB physical VMEM, v5e/v6e have 128 MiB.
    try:
        phys = int(pltpu.get_tpu_info().vmem_capacity_bytes)
    except Exception:
        phys = 64 * 1024 * 1024          # conservative fallback (v7x-sized)
    return min(int(0.75 * phys), 100 * 1024 * 1024)


def _vmem_estimate_bytes(c_in, c_out, b_tile, l, in_dtype, compute_dtype):
    bl = b_tile * l
    in_sz = jnp.dtype(in_dtype).itemsize
    cd_sz = jnp.dtype(compute_dtype).itemsize
    ci, co = _round_up(c_in, 8), _round_up(c_out, 8)
    act = bl * (
        2 * 2 * ci * in_sz                       # x block + out block, double-buffered
        + 2 * 2 * co * in_sz
        + 2 * _round_up(b_tile + 2, 8) * 4       # aux (segment matrix + masks), x2 buf
        + 3 * ci * cd_sz                         # x in compute dtype + 2 rolled taps
        + 3 * co * cd_sz                         # h in compute dtype + 2 rolled taps
        + 5 * co * 4                             # conv outputs / GN / GELU f32 temps
        + ci * 4                                 # f32 copy of x kept live for residual
    )
    wts = 2 * 3 * co * (_round_up(c_in, 128) + _round_up(c_out, 128)) * cd_sz
    par = 2 * co * 128 * 4
    return act + wts + par


def _choose_blocking(n, l, c_in, c_out, in_dtype, compute_dtype, vmem_budget):
    g = int(np.gcd(l, 128))
    b_align = 128 // g                        # smallest samples/block with BL % 128 == 0
    n_groups = int(np.ceil(n / b_align))      # aligned groups the batch spans
    # Target ~512-2048 lanes per grid step (measured tiling sweet spot).
    k = max(1, int(np.ceil(512 / (b_align * l))))
    while k > 1 and k * b_align * l > 2048:
        k -= 1
    k = min(k, n_groups)                      # never pad past one block's worth of batch
    if n_groups >= 2:                         # v7x: keep >= 2 blocks for both TCs
        k = min(k, int(np.ceil(n_groups / 2)))
    b_tile = max(1, k) * b_align
    # Shrink (in aligned steps) until the live slab fits the VMEM budget.
    while (b_tile > b_align and
           _vmem_estimate_bytes(c_in, c_out, b_tile, l, in_dtype, compute_dtype)
           > vmem_budget):
        b_tile -= b_align
    est = _vmem_estimate_bytes(c_in, c_out, b_tile, l, in_dtype, compute_dtype)
    # TODO(synk): for very large channel counts (C >= ~512) add a K-tiled reduction
    # grid axis instead of holding both weight tiles resident.
    assert est <= vmem_budget, (
        f"DoubleConv block (C_in={c_in}, C_out={c_out}, L={l}, b_tile={b_tile}) needs "
        f"~{est} B VMEM > budget {vmem_budget} B; K-tile the channel axis.")
    n_pad = _round_up(n, b_tile)
    return b_tile, n_pad, n_pad // b_tile


# --------------------------------------------------------------------------------------
# Wrappers
# --------------------------------------------------------------------------------------
def double_conv_slab(xf, params, *, l_per_sample, b_tile, residual=False,
                     compute_dtype=jnp.float32, approximate_gelu=False):
    """DoubleConv on a pre-packed (C_in, N_pad*L) slab; returns (C_out, N_pad*L).

    Layer stacks should keep activations in this layout between layers and only
    transpose at the model boundary (saves one HBM read+write pass per layer)."""
    w1, b1, g1, be1, w2, b2, g2, be2 = params
    c_in, total = xf.shape
    c_out = w1.shape[0]
    l = l_per_sample
    bl = b_tile * l
    assert total % bl == 0
    num_blocks = total // bl
    residual = residual and (c_in == c_out)   # match the PyTorch module's semantics

    # Split taps host-side: ws[k] multiplies x[l-1+k]  ->  three accumulated MXU dots.
    ws1 = jnp.transpose(w1, (2, 0, 1)).astype(compute_dtype)       # (3, C_out, C_in)
    ws2 = jnp.transpose(w2, (2, 0, 1)).astype(compute_dtype)       # (3, C_out, C_out)

    # All six per-channel parameter vectors in one (C_out, 6) tile -> single DMA.
    pvec = jnp.stack([b1, g1, be1, b2, g2, be2], axis=1).astype(jnp.float32)

    # Static per-column aux (identical for every block): 0/1 sample-membership rows
    # plus has-left / has-right neighbour masks (precomputed host-side).
    pos = np.arange(bl) % l
    seg = np.arange(bl) // l
    aux = jnp.asarray(np.concatenate(
        [np.equal.outer(np.arange(b_tile), seg).astype(np.float32),
         (pos != 0).astype(np.float32)[None, :],
         (pos != l - 1).astype(np.float32)[None, :]], axis=0))      # (b_tile+2, BL)

    kernel = _make_double_conv_kernel(residual, b_tile, l, compute_dtype,
                                      approximate_gelu)
    # NOTE(v5e): if profiling shows the x-slab DMA exposed, add
    # pipeline_mode=pl.Buffered(3) to the x BlockSpec below.
    return pl.pallas_call(
        kernel,
        out_shape=jax.ShapeDtypeStruct((c_out, total), xf.dtype),
        grid_spec=pltpu.PrefetchScalarGridSpec(
            num_scalar_prefetch=0,
            grid=(num_blocks,),
            in_specs=[
                pl.BlockSpec((c_in, bl), lambda i: (0, i)),            # x slab block
                pl.BlockSpec((3, c_out, c_in), lambda i: (0, 0, 0)),   # conv1 taps
                pl.BlockSpec((3, c_out, c_out), lambda i: (0, 0, 0)),  # conv2 taps
                pl.BlockSpec((c_out, 6), lambda i: (0, 0)),            # packed b/gamma/beta
                pl.BlockSpec((b_tile + 2, bl), lambda i: (0, 0)),      # segment + masks
            ],
            out_specs=pl.BlockSpec((c_out, bl), lambda i: (0, i)),
        ),
        compiler_params=pltpu.CompilerParams(
            dimension_semantics=("parallel",),      # independent batch blocks (v7x 2 TCs)
            vmem_limit_bytes=_vmem_budget_bytes(),
        ),
    )(xf, ws1, ws2, pvec, aux)


def double_conv(x, params, residual=False, compute_dtype=jnp.float32,
                approximate_gelu=False):
    """x: (N, C_in, L). params: (w1, b1, g1, be1, w2, b2, g2, be2)."""
    N, c_in, L = x.shape
    c_out = params[0].shape[0]
    b_tile, n_pad, _ = _choose_blocking(N, L, c_in, c_out, x.dtype, compute_dtype,
                                        _vmem_budget_bytes())

    # TODO(synk): in a layer stack, call double_conv_slab directly with a persistent
    # (C, N_pad*L) slab to avoid this per-layer transpose (an extra HBM pass each way).
    xp = jnp.zeros((n_pad, c_in, L), x.dtype).at[:N].set(x)
    xf = jnp.transpose(xp, (1, 0, 2)).reshape(c_in, n_pad * L)

    out_f = double_conv_slab(xf, params, l_per_sample=L, b_tile=b_tile,
                             residual=residual, compute_dtype=compute_dtype,
                             approximate_gelu=approximate_gelu)
    return out_f.reshape(c_out, n_pad, L).transpose(1, 0, 2)[:N]


# --------------------------------------------------------------------------------------
# Params + pure-JAX reference (for correctness check)
# --------------------------------------------------------------------------------------
def init_params(key, c_in, c_out):
    k1, k2, k3, k4 = jax.random.split(key, 4)
    s1 = 1.0 / np.sqrt(c_in * 3)
    s2 = 1.0 / np.sqrt(c_out * 3)
    w1 = jax.random.uniform(k1, (c_out, c_in, 3), jnp.float32, -s1, s1)
    b1 = jax.random.uniform(k2, (c_out,), jnp.float32, -s1, s1)
    w2 = jax.random.uniform(k3, (c_out, c_out, 3), jnp.float32, -s2, s2)
    b2 = jax.random.uniform(k4, (c_out,), jnp.float32, -s2, s2)
    g1 = jnp.ones((c_out,), jnp.float32); be1 = jnp.zeros((c_out,), jnp.float32)
    g2 = jnp.ones((c_out,), jnp.float32); be2 = jnp.zeros((c_out,), jnp.float32)
    return (w1, b1, g1, be1, w2, b2, g2, be2)


def double_conv_ref(x, params, residual=False):
    w1, b1, g1, be1, w2, b2, g2, be2 = params

    def conv1d(h, w, b):
        y = jax.lax.conv_general_dilated(
            h, w, window_strides=(1,), padding=((1, 1),),
            dimension_numbers=("NCH", "OIH", "NCH"),
            precision=jax.lax.Precision.HIGHEST)
        return y + b[None, :, None]

    def gn(h, g, be):
        mu = h.mean(axis=(1, 2), keepdims=True)
        var = ((h - mu) ** 2).mean(axis=(1, 2), keepdims=True)
        return (h - mu) / jnp.sqrt(var + _GN_EPS) * g[None, :, None] + be[None, :, None]

    h = _gelu(gn(conv1d(x, w1, b1), g1, be1), False)
    out = gn(conv1d(h, w2, b2), g2, be2)
    residual = residual and (x.shape[1] == w1.shape[0])
    return _gelu(x + out, False) if residual else out


if __name__ == "__main__":
    key = jax.random.PRNGKey(0)
    kx, kx2, kp1, kp2, kp3 = jax.random.split(key, 5)

    # Case 1: module defaults (no residual), in=4 -> out=8, f32 MXU path, tiny shape.
    # Tolerance covers TPU matmul-precision differences vs the XLA conv reference.
    x = jax.random.normal(kx, (2, 4, 16), jnp.float32)
    params = init_params(kp1, 4, 8)
    y = jax.block_until_ready(double_conv(x, params, residual=False))
    np.testing.assert_allclose(np.asarray(y), np.asarray(double_conv_ref(x, params)),
                               atol=2e-2, rtol=2e-2)

    # Case 2: residual path (in_channels == out_channels), f32.
    params2 = init_params(kp2, 4, 4)
    y2 = jax.block_until_ready(double_conv(x, params2, residual=True))
    np.testing.assert_allclose(np.asarray(y2),
                               np.asarray(double_conv_ref(x, params2, residual=True)),
                               atol=2e-2, rtol=2e-2)

    # Case 3: larger, non-aligned batch -> exercises lane-dense multi-block grid
    # (>= 2 blocks for the v7x parallel axis) and batch padding.
    x3 = jax.random.normal(kx2, (37, 16, 16), jnp.float32)
    params3 = init_params(kp3, 16, 32)
    y3 = jax.block_until_ready(double_conv(x3, params3, residual=False))
    np.testing.assert_allclose(np.asarray(y3), np.asarray(double_conv_ref(x3, params3)),
                               atol=2e-2, rtol=2e-2)

    # Case 4: bf16 MXU inputs (f32 accumulation, f32 GroupNorm/GELU) — looser tolerance.
    y4 = jax.block_until_ready(double_conv(x, params, residual=False,
                                           compute_dtype=jnp.bfloat16))
    np.testing.assert_allclose(np.asarray(y4), np.asarray(double_conv_ref(x, params)),
                               atol=1e-1, rtol=1e-1)

    # TODO(synk): the use_bn=True BatchNorm1d branch and nn.Dropout with p>0 (training
    # RNG) are not modeled; module defaults (GroupNorm, dropout=0 -> Identity) only.
    print("KERNEL_OK")
</pallas_src>

<mosaic_0001>
module attributes {stable_mosaic.version = 11 : i64} {
  func.func @kernel(%arg0: i32, %arg1: memref<4x128xf32, #tpu.memory_space<vmem>>, %arg2: memref<3x8x4xf32, #tpu.memory_space<vmem>>, %arg3: memref<3x8x8xf32, #tpu.memory_space<vmem>>, %arg4: memref<8x6xf32, #tpu.memory_space<vmem>>, %arg5: memref<10x128xf32, #tpu.memory_space<vmem>>, %arg6: memref<8x128xf32, #tpu.memory_space<vmem>>) attributes {dimension_semantics = [#tpu.dimension_semantics<parallel>], iteration_bounds = array<i64: 1>, scalar_prefetch = 0 : i64, scratch_operands = 0 : i64, tpu.core_type = #tpu.core_type<tc>, window_params = [{transform_indices = @transform_0, window_bounds = array<i64: 4, 128>}, {pipeline_mode = #tpu.pipeline_mode<synchronous>, transform_indices = @transform_1, window_bounds = array<i64: 3, 8, 4>}, {pipeline_mode = #tpu.pipeline_mode<synchronous>, transform_indices = @transform_2, window_bounds = array<i64: 3, 8, 8>}, {pipeline_mode = #tpu.pipeline_mode<synchronous>, transform_indices = @transform_3, window_bounds = array<i64: 8, 6>}, {pipeline_mode = #tpu.pipeline_mode<synchronous>, transform_indices = @transform_4, window_bounds = array<i64: 10, 128>}, {transform_indices = @transform_5, window_bounds = array<i64: 8, 128>}]} {
    %c0 = arith.constant 0 : index
    %c0_0 = arith.constant 0 : index
    %0 = vector.load %arg5[%c0, %c0_0] : memref<10x128xf32, #tpu.memory_space<vmem>>, vector<10x128xf32>
    %1 = vector.extract_strided_slice %0 {offsets = [0, 0], sizes = [8, 128], strides = [1, 1]} : vector<10x128xf32> to vector<8x128xf32>
    %2 = vector.extract_strided_slice %0 {offsets = [8, 0], sizes = [1, 128], strides = [1, 1]} : vector<10x128xf32> to vector<1x128xf32>
    %cst = arith.constant 0.000000e+00 : f32
    %3 = vector.broadcast %cst : f32 to vector<1x128xf32>
    %4 = arith.cmpf one, %2, %3 : vector<1x128xf32>
    %5 = vector.extract_strided_slice %0 {offsets = [9, 0], sizes = [1, 128], strides = [1, 1]} : vector<10x128xf32> to vector<1x128xf32>
    %cst_1 = arith.constant 0.000000e+00 : f32
    %6 = vector.broadcast %cst_1 : f32 to vector<1x128xf32>
    %7 = arith.cmpf one, %5, %6 : vector<1x128xf32>
    %c0_2 = arith.constant 0 : index
    %c0_3 = arith.constant 0 : index
    %8 = vector.load %arg4[%c0_2, %c0_3] : memref<8x6xf32, #tpu.memory_space<vmem>>, vector<8x6xf32>
    %9 = vector.extract_strided_slice %8 {offsets = [0, 0], sizes = [8, 1], strides = [1, 1]} : vector<8x6xf32> to vector<8x1xf32>
    %10 = vector.extract_strided_slice %8 {offsets = [0, 1], sizes = [8, 1], strides = [1, 1]} : vector<8x6xf32> to vector<8x1xf32>
    %11 = vector.extract_strided_slice %8 {offsets = [0, 2], sizes = [8, 1], strides = [1, 1]} : vector<8x6xf32> to vector<8x1xf32>
    %12 = vector.extract_strided_slice %8 {offsets = [0, 3], sizes = [8, 1], strides = [1, 1]} : vector<8x6xf32> to vector<8x1xf32>
    %13 = vector.extract_strided_slice %8 {offsets = [0, 4], sizes = [8, 1], strides = [1, 1]} : vector<8x6xf32> to vector<8x1xf32>
    %14 = vector.extract_strided_slice %8 {offsets = [0, 5], sizes = [8, 1], strides = [1, 1]} : vector<8x6xf32> to vector<8x1xf32>
    %c0_4 = arith.constant 0 : index
    %c0_5 = arith.constant 0 : index
    %15 = vector.load %arg1[%c0_4, %c0_5] : memref<4x128xf32, #tpu.memory_space<vmem>>, vector<4x128xf32>
    %c1_i32 = arith.constant 1 : i32
    %16 = tpu.dynamic_rotate %15 by %c1_i32 dim 1 : vector<4x128xf32>, i32 -> vector<4x128xf32>
    %c0_i32 = arith.constant 0 : i32
    %17 = arith.sitofp %c0_i32 : i32 to f32
    %18 = vector.shape_cast %4 : vector<1x128xi1> to vector<1x128xi1>
    %19 = vector.broadcast %18 : vector<1x128xi1> to vector<4x128xi1>
    %20 = vector.broadcast %17 : f32 to vector<4x128xf32>
    %21 = arith.select %19, %16, %20 : vector<4x128xi1>, vector<4x128xf32>
    %c127_i32 = arith.constant 127 : i32
    %22 = tpu.dynamic_rotate %15 by %c127_i32 dim 1 : vector<4x128xf32>, i32 -> vector<4x128xf32>
    %c0_i32_6 = arith.constant 0 : i32
    %23 = arith.sitofp %c0_i32_6 : i32 to f32
    %24 = vector.shape_cast %7 : vector<1x128xi1> to vector<1x128xi1>
    %25 = vector.broadcast %24 : vector<1x128xi1> to vector<4x128xi1>
    %26 = vector.broadcast %23 : f32 to vector<4x128xf32>
    %27 = arith.select %25, %22, %26 : vector<4x128xi1>, vector<4x128xf32>
    %c1 = arith.constant 1 : index
    %c0_7 = arith.constant 0 : index
    %c0_8 = arith.constant 0 : index
    %28 = vector.load %arg2[%c1, %c0_7, %c0_8] : memref<3x8x4xf32, #tpu.memory_space<vmem>>, vector<1x8x4xf32>
    %29 = vector.shape_cast %28 : vector<1x8x4xf32> to vector<8x4xf32>
    %cst_9 = arith.constant dense<0.000000e+00> : vector<8x128xf32>
    %30 = tpu.matmul %29, %15, %cst_9 {dimension_numbers = #tpu.dot_dimension_numbers<[1], [0], [0], [1], [0, 0, 1, 1], [], []>} : vector<8x4xf32>, vector<4x128xf32>, vector<8x128xf32> -> vector<8x128xf32>
    %c0_10 = arith.constant 0 : index
    %c0_11 = arith.constant 0 : index
    %c0_12 = arith.constant 0 : index
    %31 = vector.load %arg2[%c0_10, %c0_11, %c0_12] : memref<3x8x4xf32, #tpu.memory_space<vmem>>, vector<1x8x4xf32>
    %32 = vector.shape_cast %31 : vector<1x8x4xf32> to vector<8x4xf32>
    %cst_13 = arith.constant dense<0.000000e+00> : vector<8x128xf32>
    %33 = tpu.matmul %32, %21, %cst_13 {dimension_numbers = #tpu.dot_dimension_numbers<[1], [0], [0], [1], [0, 0, 1, 1], [], []>} : vector<8x4xf32>, vector<4x128xf32>, vector<8x128xf32> -> vector<8x128xf32>
    %34 = arith.addf %30, %33 : vector<8x128xf32>
    %c2 = arith.constant 2 : index
    %c0_14 = arith.constant 0 : index
    %c0_15 = arith.constant 0 : index
    %35 = vector.load %arg2[%c2, %c0_14, %c0_15] : memref<3x8x4xf32, #tpu.memory_space<vmem>>, vector<1x8x4xf32>
    %36 = vector.shape_cast %35 : vector<1x8x4xf32> to vector<8x4xf32>
    %cst_16 = arith.constant dense<0.000000e+00> : vector<8x128xf32>
    %37 = tpu.matmul %36, %27, %cst_16 {dimension_numbers = #tpu.dot_dimension_numbers<[1], [0], [0], [1], [0, 0, 1, 1], [], []>} : vector<8x4xf32>, vector<4x128xf32>, vector<8x128xf32> -> vector<8x128xf32>
    %38 = arith.addf %34, %37 : vector<8x128xf32>
    %39 = vector.broadcast %9 : vector<8x1xf32> to vector<8x128xf32>
    %40 = arith.addf %38, %39 : vector<8x128xf32>
    %cst_17 = arith.constant dense<0.000000e+00> : vector<128xf32>
    %41 = vector.multi_reduction <add>, %40, %cst_17 [0] : vector<8x128xf32> to vector<128xf32>
    %42 = vector.shape_cast %41 : vector<128xf32> to vector<1x128xf32>
    %43 = arith.mulf %40, %40 : vector<8x128xf32>
    %cst_18 = arith.constant dense<0.000000e+00> : vector<128xf32>
    %44 = vector.multi_reduction <add>, %43, %cst_18 [0] : vector<8x128xf32> to vector<128xf32>
    %45 = vector.shape_cast %44 : vector<128xf32> to vector<1x128xf32>
    %46 = tpu.concatenate %42, %45 in 0 : vector<1x128xf32>, vector<1x128xf32> -> vector<2x128xf32>
    %cst_19 = arith.constant dense<0.000000e+00> : vector<2x8xf32>
    %47 = tpu.matmul %46, %1, %cst_19 {dimension_numbers = #tpu.dot_dimension_numbers<[1], [1], [0], [0], [0, 0, 1, 0], [], []>} : vector<2x128xf32>, vector<8x128xf32>, vector<2x8xf32> -> vector<2x8xf32>
    %cst_20 = arith.constant 7.812500e-03 : f32
    %48 = vector.broadcast %cst_20 : f32 to vector<2x8xf32>
    %49 = arith.mulf %47, %48 : vector<2x8xf32>
    %50 = vector.extract_strided_slice %49 {offsets = [0, 0], sizes = [1, 8], strides = [1, 1]} : vector<2x8xf32> to vector<1x8xf32>
    %51 = vector.extract_strided_slice %49 {offsets = [1, 0], sizes = [1, 8], strides = [1, 1]} : vector<2x8xf32> to vector<1x8xf32>
    %52 = arith.mulf %50, %50 : vector<1x8xf32>
    %53 = arith.subf %51, %52 : vector<1x8xf32>
    %cst_21 = arith.constant 9.99999974E-6 : f32
    %54 = vector.broadcast %cst_21 : f32 to vector<1x8xf32>
    %55 = arith.addf %53, %54 : vector<1x8xf32>
    %56 = math.rsqrt %55 : vector<1x8xf32>
    %cst_22 = arith.constant 0.000000e+00 : f32
    %57 = vector.broadcast %cst_22 : f32 to vector<1x8xf32>
    %58 = arith.subf %57, %50 : vector<1x8xf32>
    %59 = arith.mulf %58, %56 : vector<1x8xf32>
    %60 = tpu.concatenate %59, %56 in 0 : vector<1x8xf32>, vector<1x8xf32> -> vector<2x8xf32>
    %cst_23 = arith.constant dense<0.000000e+00> : vector<2x128xf32>
    %61 = tpu.matmul %60, %1, %cst_23 {dimension_numbers = #tpu.dot_dimension_numbers<[1], [0], [0], [1], [0, 0, 1, 1], [], []>} : vector<2x8xf32>, vector<8x128xf32>, vector<2x128xf32> -> vector<2x128xf32>
    %62 = vector.extract_strided_slice %61 {offsets = [0, 0], sizes = [1, 128], strides = [1, 1]} : vector<2x128xf32> to vector<1x128xf32>
    %63 = vector.extract_strided_slice %61 {offsets = [1, 0], sizes = [1, 128], strides = [1, 1]} : vector<2x128xf32> to vector<1x128xf32>
    %64 = vector.broadcast %63 : vector<1x128xf32> to vector<8x128xf32>
    %65 = arith.mulf %40, %64 : vector<8x128xf32>
    %66 = vector.broadcast %62 : vector<1x128xf32> to vector<8x128xf32>
    %67 = arith.addf %65, %66 : vector<8x128xf32>
    %68 = vector.broadcast %10 : vector<8x1xf32> to vector<8x128xf32>
    %69 = arith.mulf %67, %68 : vector<8x128xf32>
    %70 = vector.broadcast %11 : vector<8x1xf32> to vector<8x128xf32>
    %71 = arith.addf %69, %70 : vector<8x128xf32>
    %cst_24 = arith.constant 5.000000e-01 : f32
    %72 = vector.broadcast %cst_24 : f32 to vector<8x128xf32>
    %73 = arith.mulf %72, %71 : vector<8x128xf32>
    %cst_25 = arith.constant 0.707106769 : f32
    %74 = vector.broadcast %cst_25 : f32 to vector<8x128xf32>
    %75 = arith.mulf %71, %74 : vector<8x128xf32>
    %76 = math.erf %75 : vector<8x128xf32>
    %cst_26 = arith.constant 1.000000e+00 : f32
    %77 = vector.broadcast %cst_26 : f32 to vector<8x128xf32>
    %78 = arith.addf %77, %76 : vector<8x128xf32>
    %79 = arith.mulf %73, %78 : vector<8x128xf32>
    %c1_i32_27 = arith.constant 1 : i32
    %80 = tpu.dynamic_rotate %79 by %c1_i32_27 dim 1 : vector<8x128xf32>, i32 -> vector<8x128xf32>
    %c0_i32_28 = arith.constant 0 : i32
    %81 = arith.sitofp %c0_i32_28 : i32 to f32
    %82 = vector.shape_cast %4 : vector<1x128xi1> to vector<1x128xi1>
    %83 = vector.broadcast %82 : vector<1x128xi1> to vector<8x128xi1>
    %84 = vector.broadcast %81 : f32 to vector<8x128xf32>
    %85 = arith.select %83, %80, %84 : vector<8x128xi1>, vector<8x128xf32>
    %c127_i32_29 = arith.constant 127 : i32
    %86 = tpu.dynamic_rotate %79 by %c127_i32_29 dim 1 : vector<8x128xf32>, i32 -> vector<8x128xf32>
    %c0_i32_30 = arith.constant 0 : i32
    %87 = arith.sitofp %c0_i32_30 : i32 to f32
    %88 = vector.shape_cast %7 : vector<1x128xi1> to vector<1x128xi1>
    %89 = vector.broadcast %88 : vector<1x128xi1> to vector<8x128xi1>
    %90 = vector.broadcast %87 : f32 to vector<8x128xf32>
    %91 = arith.select %89, %86, %90 : vector<8x128xi1>, vector<8x128xf32>
    %c1_31 = arith.constant 1 : index
    %c0_32 = arith.constant 0 : index
    %c0_33 = arith.constant 0 : index
    %92 = vector.load %arg3[%c1_31, %c0_32, %c0_33] : memref<3x8x8xf32, #tpu.memory_space<vmem>>, vector<1x8x8xf32>
    %93 = vector.shape_cast %92 : vector<1x8x8xf32> to vector<8x8xf32>
    %cst_34 = arith.constant dense<0.000000e+00> : vector<8x128xf32>
    %94 = tpu.matmul %93, %79, %cst_34 {dimension_numbers = #tpu.dot_dimension_numbers<[1], [0], [0], [1], [0, 0, 1, 1], [], []>} : vector<8x8xf32>, vector<8x128xf32>, vector<8x128xf32> -> vector<8x128xf32>
    %c0_35 = arith.constant 0 : index
    %c0_36 = arith.constant 0 : index
    %c0_37 = arith.constant 0 : index
    %95 = vector.load %arg3[%c0_35, %c0_36, %c0_37] : memref<3x8x8xf32, #tpu.memory_space<vmem>>, vector<1x8x8xf32>
    %96 = vector.shape_cast %95 : vector<1x8x8xf32> to vector<8x8xf32>
    %cst_38 = arith.constant dense<0.000000e+00> : vector<8x128xf32>
    %97 = tpu.matmul %96, %85, %cst_38 {dimension_numbers = #tpu.dot_dimension_numbers<[1], [0], [0], [1], [0, 0, 1, 1], [], []>} : vector<8x8xf32>, vector<8x128xf32>, vector<8x128xf32> -> vector<8x128xf32>
    %98 = arith.addf %94, %97 : vector<8x128xf32>
    %c2_39 = arith.constant 2 : index
    %c0_40 = arith.constant 0 : index
    %c0_41 = arith.constant 0 : index
    %99 = vector.load %arg3[%c2_39, %c0_40, %c0_41] : memref<3x8x8xf32, #tpu.memory_space<vmem>>, vector<1x8x8xf32>
    %100 = vector.shape_cast %99 : vector<1x8x8xf32> to vector<8x8xf32>
    %cst_42 = arith.constant dense<0.000000e+00> : vector<8x128xf32>
    %101 = tpu.matmul %100, %91, %cst_42 {dimension_numbers = #tpu.dot_dimension_numbers<[1], [0], [0], [1], [0, 0, 1, 1], [], []>} : vector<8x8xf32>, vector<8x128xf32>, vector<8x128xf32> -> vector<8x128xf32>
    %102 = arith.addf %98, %101 : vector<8x128xf32>
    %103 = vector.broadcast %12 : vector<8x1xf32> to vector<8x128xf32>
    %104 = arith.addf %102, %103 : vector<8x128xf32>
    %cst_43 = arith.constant dense<0.000000e+00> : vector<128xf32>
    %105 = vector.multi_reduction <add>, %104, %cst_43 [0] : vector<8x128xf32> to vector<128xf32>
    %106 = vector.shape_cast %105 : vector<128xf32> to vector<1x128xf32>
    %107 = arith.mulf %104, %104 : vector<8x128xf32>
    %cst_44 = arith.constant dense<0.000000e+00> : vector<128xf32>
    %108 = vector.multi_reduction <add>, %107, %cst_44 [0] : vector<8x128xf32> to vector<128xf32>
    %109 = vector.shape_cast %108 : vector<128xf32> to vector<1x128xf32>
    %110 = tpu.concatenate %106, %109 in 0 : vector<1x128xf32>, vector<1x128xf32> -> vector<2x128xf32>
    %cst_45 = arith.constant dense<0.000000e+00> : vector<2x8xf32>
    %111 = tpu.matmul %110, %1, %cst_45 {dimension_numbers = #tpu.dot_dimension_numbers<[1], [1], [0], [0], [0, 0, 1, 0], [], []>} : vector<2x128xf32>, vector<8x128xf32>, vector<2x8xf32> -> vector<2x8xf32>
    %cst_46 = arith.constant 7.812500e-03 : f32
    %112 = vector.broadcast %cst_46 : f32 to vector<2x8xf32>
    %113 = arith.mulf %111, %112 : vector<2x8xf32>
    %114 = vector.extract_strided_slice %113 {offsets = [0, 0], sizes = [1, 8], strides = [1, 1]} : vector<2x8xf32> to vector<1x8xf32>
    %115 = vector.extract_strided_slice %113 {offsets = [1, 0], sizes = [1, 8], strides = [1, 1]} : vector<2x8xf32> to vector<1x8xf32>
    %116 = arith.mulf %114, %114 : vector<1x8xf32>
    %117 = arith.subf %115, %116 : vector<1x8xf32>
    %cst_47 = arith.constant 9.99999974E-6 : f32
    %118 = vector.broadcast %cst_47 : f32 to vector<1x8xf32>
    %119 = arith.addf %117, %118 : vector<1x8xf32>
    %120 = math.rsqrt %119 : vector<1x8xf32>
    %cst_48 = arith.constant 0.000000e+00 : f32
    %121 = vector.broadcast %cst_48 : f32 to vector<1x8xf32>
    %122 = arith.subf %121, %114 : vector<1x8xf32>
    %123 = arith.mulf %122, %120 : vector<1x8xf32>
    %124 = tpu.concatenate %123, %120 in 0 : vector<1x8xf32>, vector<1x8xf32> -> vector<2x8xf32>
    %cst_49 = arith.constant dense<0.000000e+00> : vector<2x128xf32>
    %125 = tpu.matmul %124, %1, %cst_49 {dimension_numbers = #tpu.dot_dimension_numbers<[1], [0], [0], [1], [0, 0, 1, 1], [], []>} : vector<2x8xf32>, vector<8x128xf32>, vector<2x128xf32> -> vector<2x128xf32>
    %126 = vector.extract_strided_slice %125 {offsets = [0, 0], sizes = [1, 128], strides = [1, 1]} : vector<2x128xf32> to vector<1x128xf32>
    %127 = vector.extract_strided_slice %125 {offsets = [1, 0], sizes = [1, 128], strides = [1, 1]} : vector<2x128xf32> to vector<1x128xf32>
    %128 = vector.broadcast %127 : vector<1x128xf32> to vector<8x128xf32>
    %129 = arith.mulf %104, %128 : vector<8x128xf32>
    %130 = vector.broadcast %126 : vector<1x128xf32> to vector<8x128xf32>
    %131 = arith.addf %129, %130 : vector<8x128xf32>
    %132 = vector.broadcast %13 : vector<8x1xf32> to vector<8x128xf32>
    %133 = arith.mulf %131, %132 : vector<8x128xf32>
    %134 = vector.broadcast %14 : vector<8x1xf32> to vector<8x128xf32>
    %135 = arith.addf %133, %134 : vector<8x128xf32>
    %c0_50 = arith.constant 0 : index
    %c0_51 = arith.constant 0 : index
    %136 = vector.load %arg6[%c0_50, %c0_51] : memref<8x128xf32, #tpu.memory_space<vmem>>, vector<8x128xf32>
    tpu.vector_store %arg6[%c0_50, %c0_51], %135 {strides = array<i32>} : memref<8x128xf32, #tpu.memory_space<vmem>>, vector<8x128xf32>,
    return
  }
  func.func @transform_0(%arg0: i32) -> (i32, i32) {
    %c0_i32 = arith.constant 0 : i32
    %c0_i32_0 = arith.constant 0 : i32
    return %c0_i32, %arg0 : i32, i32
  }
  func.func @transform_1(%arg0: i32) -> (i32, i32, i32) {
    %c0_i32 = arith.constant 0 : i32
    %c0_i32_0 = arith.constant 0 : i32
    %c0_i32_1 = arith.constant 0 : i32
    %c0_i32_2 = arith.constant 0 : i32
    return %c0_i32, %c0_i32_0, %c0_i32_1 : i32, i32, i32
  }
  func.func @transform_2(%arg0: i32) -> (i32, i32, i32) {
    %c0_i32 = arith.constant 0 : i32
    %c0_i32_0 = arith.constant 0 : i32
    %c0_i32_1 = arith.constant 0 : i32
    %c0_i32_2 = arith.constant 0 : i32
    return %c0_i32, %c0_i32_0, %c0_i32_1 : i32, i32, i32
  }
  func.func @transform_3(%arg0: i32) -> (i32, i32) {
    %c0_i32 = arith.constant 0 : i32
    %c0_i32_0 = arith.constant 0 : i32
    %c0_i32_1 = arith.constant 0 : i32
    return %c0_i32, %c0_i32_0 : i32, i32
  }
  func.func @transform_4(%arg0: i32) -> (i32, i32) {
    %c0_i32 = arith.constant 0 : i32
    %c0_i32_0 = arith.constant 0 : i32
    %c0_i32_1 = arith.constant 0 : i32
    return %c0_i32, %c0_i32_0 : i32, i32
  }
  func.func @transform_5(%arg0: i32) -> (i32, i32) {
    %c0_i32 = arith.constant 0 : i32
    %c0_i32_0 = arith.constant 0 : i32
    return %c0_i32, %arg0 : i32, i32
  }
}

</mosaic_0001>

<bundles_post_ra>
// kernel: tpu_custom_call.1
= control target key start
LH: loop header
LB: loop body
LE: loop exit
PB: predicated region body
PF: predicated region fallthrough
CT: control target
= control target key end

     0   :  { %10 = vsyncpa [#allocation3], 0  ;;  %s698_s0 = inlined_call_operand.vmem [shape: f32[4,128], index: 0, kind: input, shape index: {}]   ;;  %s699_s1 = inlined_call_operand.vmem [shape: f32[3,8,4], index: 1, kind: input, shape index: {}]   ;;  %s700_s2 = inlined_call_operand.vmem [shape: f32[3,8,8], index: 2, kind: input, shape index: {}]   ;;  %s701_s3 = inlined_call_operand.vmem [shape: f32[8,6], index: 3, kind: input, shape index: {}]   ;;  %s702_s4 = inlined_call_operand.hbm [shape: f32[10,128], index: 4, kind: input, shape index: {}]   ;;  %s703_s5 = inlined_call_operand.hbm [shape: f32[8,128], index: 5, kind: output, shape index: {}]  }
   0x1   :  { %11 = vsyncpa [#allocation4], 0  ;;  %s24_s20 = sshll.u32 %s702_s4, 4  ;;  %s577_s21 = smov [#allocation2]   ;;  %s25_s20 = int_to_ptr.hbm [resolvable:$true] %s24_s20 }
   0x2   :  { %s26_s22 = sshll.u32 %s577_s21, 4  ;;  %s578_s23 = smov 128   ;;  %s27_s22 = int_to_ptr.vmem [resolvable:$true] %s26_s22 }
   0x3   :  { %s579_s24 = smov 8  }
   0x4   :  { %32 = dma.hbm_to_vmem [thread:$0]  %s25_s20, 256, %s27_s22, [#allocation3], %s578_s23, %s578_s23, %s579_s24  }
   0x5   :  { %573 = dma.done.wait [#allocation3], 256  }
   0x6   :  { %574 = vsyncadd [#allocation3], 4294967040  ;;  %v41_v0 = vld [vmem:[%s698_s0] sm:$0xf]  ;;  %s580_s27 = smov 127   ;;  %s581_s28 = smov 1  }
   0x7   :  { %48 = vrot.lane.b32.xlu0 %v41_v0, %s580_s27  ;;  %v582_v1 = vmov 0   ;;  %vm60_vm0 = vcmask 1043456   ;;  %vm56_vm1 = vcmask 31744   ;;  %v483_v2 = vld [vmem:[%s699_s1 + $0x8] sm:$0xff]  ;;  %v635_v3 = vld [vmem:[%s701_s3] sm:$0xff]  ;;  %v488_v9 = vld [vmem:[%s699_s1 + $0x10] sm:$0xff] }
   0x8   :  { %513 = vset.pattern.permute.xlu1 %v582_v1  ;;  %486 = vmatpush.msk.msra.mxu1 %vm60_vm0, %v41_v0  ;;  %v38_v4 = vld [vmem:[#allocation2 + $0x8] sm:$0x3]  ;;  %v55_v14 = vld [vmem:[%s699_s1] sm:$0xff]  ;;  %vm158_vm5 = vcmask 1040384   ;;  %v583_v41 = vmov 1   ;;  %v584_v42 = vmov 2  }
   0x9   :  { %487 = vmatmul.msk.f32.vlgmr.msra.gmra.mxu1 %vm56_vm1, %v483_v2  ;;  %141 = vperm.xlu1 %513, %v635_v3   ;;  %vm39_vm2 = vcmp.ne.f32.partialorder %v38_v4, 0.0  ;;  %v660_v16 = vld [vmem:[#allocation2] sm:$0xff]  ;;  %vm203_vm9 = vcmask 64512   ;;  %s473_s17 = sshll.u32 %s703_s5, 4  ;;  %s474_s17 = int_to_ptr.hbm [resolvable:$true] %s473_s17 }
   0xa   :  { %v44_v5 = vsel %vm39_vm2, 1, %v582_v1  ;;  %175 = vmatpush.xpose.msra.mxu3 %v660_v16  ;;  %515 = vset.pattern.permute.xlu2 %v584_v42 }
   0xb   :  { %v50_v6 = vperm.slane %v44_v5, 1  ;;  %v45_v11 = vperm.slane %v44_v5, 0  ;;  %237 = vperm.xlu2 %515, %v635_v3  }
   0xd   :  { %vm638_vm3 = vcmp.eq.s32.totalorder %v50_v6, 1  ;;  %vm649_vm4 = vcmp.eq.s32.totalorder %v45_v11, 1 }
   0xf   :  { %42 = vrot.lane.b32.xlu0 %v41_v0, %s581_s28 }
  0x11   :  { %514 = vset.pattern.permute.xlu1 %v583_v41 }
  0x12   :  { %232 = vperm.xlu1 %514, %v635_v3  }
  0x65   :  { %v238_v63 = vpop.permute.xlu2 %237 }
  0x79   :  { %v49_v8 = vpop.permute.xlu0 %48 }
  0x7a   :  { %v52_v10 = vsel %vm638_vm3, %v49_v8, 0.0 }
  0x7b   :  { %489 = vmatpush.msk.msra.mxu2 %vm60_vm0, %v52_v10  ;;  %v142_v21 = vpop.permute.xlu1 %141 }
  0x7c   :  { %490 = vmatmul.msk.f32.vlgmr.msra.gmra.mxu2 %vm56_vm1, %v488_v9 }
  0x81   :  { %v43_v13 = vpop.permute.xlu0 %42 }
  0x82   :  { %v47_v15 = vsel %vm649_vm4, %v43_v13, 0.0 }
  0x83   :  { %484 = vmatpush.msk.msra.mxu0 %vm60_vm0, %v47_v15 }
  0x84   :  { %485 = vmatmul.msk.f32.vlgmr.msra.gmra.mxu0 %vm56_vm1, %v55_v14  ;;  %v233_v61 = vpop.permute.xlu1 %232 }
  0x85   :  { %222 = vmatpush.msrb.mxu0 %v660_v16 }
  0x86   :  { %v107_v17 = vpop.f32.mrf.mxu1 }
  0x87   :  { %400 = vmatpush.xpose.msra.mxu0 %v660_v16 }
  0xff   :  { %v135_v19 = vpop.f32.mrf.mxu2 }
 0x101   :  { %v81_v18 = vpop.f32.mrf.mxu0 }
 0x102   :  { %v108_v20 = vadd.f32 %v107_v17, %v81_v18 }
 0x104   :  { %v138_v22 = vadd.f32 %v135_v19, %v108_v20 }
 0x106   :  { %v144_v23 = vadd.f32 %v142_v21, %v138_v22 }
 0x108   :  { %v145_v24 = vrot.slane %v144_v23, 4  ;;  %v151_v25 = vmul.f32 %v144_v23, %v144_v23 }
 0x10a   :  { %v146_v26 = vadd.f32 %v145_v24, %v144_v23  ;;  %v152_v27 = vrot.slane %v151_v25, 4 }
 0x10c   :  { %v147_v28 = vrot.slane %v146_v26, 2  ;;  %v153_v29 = vadd.f32 %v152_v27, %v151_v25 }
 0x10e   :  { %v148_v30 = vadd.f32 %v147_v28, %v146_v26  ;;  %v154_v31 = vrot.slane %v153_v29, 2 }
 0x110   :  { %v149_v32 = vrot.slane %v148_v30, 1  ;;  %v155_v33 = vadd.f32 %v154_v31, %v153_v29 }
 0x112   :  { %v156_v34 = vrot.slane %v155_v33, 1  ;;  %v150_v35 = vadd.f32 %v149_v32, %v148_v30 }
 0x114   :  { %v157_v36 = vadd.f32 %v156_v34, %v155_v33 }
 0x116   :  { %v159_v37 = vsel %vm158_vm5, %v150_v35, %v157_v36 }
 0x117   :  { %176 = vmatmul.f32.vlgmr.msra.gmra.mxu3 %v159_v37 }
 0x19a   :  { %v177_v38 = vpop.f32.mrf.mxu3 }
 0x19b   :  { %v180_v39 = vmul.f32 0.0078125, %v177_v38 }
 0x19d   :  { %v181_v40 = vmul.f32 %v180_v39, %v180_v39  ;;  %v197_v53 = vsub.f32 0.0, %v180_v39 }
 0x19f   :  { %v183_v43 = vrot.slane %v181_v40, 7 }
 0x1a1   :  { %v185_v44 = vsub.f32 %v180_v39, %v183_v43 }
 0x1a3   :  { %v186_v45 = vadd.f32 1e-05, %v185_v44 }
 0x1a5   :  { %519 = vrsqrt.f32 %v186_v45  ;;  %vm193_vm7 = vweird.f32 %v186_v45 }
 0x1ab   :  { %v520_v46 = vpop.eup %519 }
 0x1ac   :  { %v188_v47 = vmul.f32 %v520_v46, %v186_v45  ;;  %vm194_vm6 = vweird.f32 %v520_v46  ;;  %v493_v45 = vld [vmem:[%s700_s2 + $0x8] sm:$0xff] }
 0x1ad   :  { %vm195_vm8 = vmor %vm193_vm7, %vm194_vm6 }
 0x1ae   :  { %v189_v48 = vmul.f32 %v520_v46, %v188_v47  ;;  %v497_v47 = vld [vmem:[%s700_s2 + $0x10] sm:$0xff] }
 0x1b0   :  { %v190_v49 = vmul.f32 0.5, %v189_v48 }
 0x1b2   :  { %v191_v50 = vsub.f32 1.5, %v190_v49  ;;  %v293_v49 = vld [vmem:[%s700_s2] sm:$0xff]  ;;  %s588_s2 = smov [#allocation5]  }
 0x1b3   :  { %s471_s14 = sshll.u32 %s588_s2, 4  ;;  %s472_s14 = int_to_ptr.vmem [resolvable:$true] %s471_s14 }
 0x1b4   :  { %v192_v51 = vmul.f32 %v520_v46, %v191_v50 }
 0x1b6   :  { %v196_v52 = vsel %vm195_vm8, %v520_v46, %v192_v51  ;;  %v585_v46 = vmov 3  }
 0x1b7   :  { %v199_v54 = vrot.slane %v196_v52, 1  ;;  %516 = vset.pattern.permute.xlu1 %v585_v46 }
 0x1b8   :  { %367 = vperm.xlu1 %516, %v635_v3  }
 0x1b9   :  { %v201_v55 = vmul.f32 %v199_v54, %v197_v53 }
 0x1bb   :  { %v202_v56 = vsel %vm158_vm5, %v201_v55, %v196_v52 }
 0x1bc   :  { %491 = vmatmul.msk.f32.vlgmr.msrb.gmra.mxu0 %vm203_vm9, %v202_v56 }
 0x22a   :  { %v368_v7 = vpop.permute.xlu1 %367 }
 0x239   :  { %v224_v57 = vpop.f32.mrf.mxu0 }
 0x23a   :  { %v227_v58 = vperm.slane %v224_v57, 1  ;;  %v229_v60 = vperm.slane %v224_v57, 0 }
 0x23c   :  { %v228_v59 = vmul.f32 %v227_v58, %v144_v23 }
 0x23e   :  { %v230_v62 = vadd.f32 %v229_v60, %v228_v59 }
 0x240   :  { %v235_v0 = vmul.f32 %v233_v61, %v230_v62 }
 0x242   :  { %v240_v1 = vadd.f32 %v238_v63, %v235_v0 }
 0x244   :  { %v242_v2 = vmul.f32 0.70710677, %v240_v1  ;;  %v241_v42 = vmul.f32 0.5, %v240_v1 }
 0x246   :  { %v243_v4 = vmul.f32 %v242_v2, %v242_v2 }
 0x248   :  { %v244_v5 = vmin.f32 %v243_v4, 16.0 }
 0x24a   :  { %v245_v6 = vmul.f32 2.1237322e-06, %v244_v5  ;;  %v256_v8 = vmul.f32 3.8918573e-05, %v244_v5 }
 0x24c   :  { %v246_v9 = vadd.f32 0.00028619796, %v245_v6  ;;  %v257_v10 = vadd.f32 0.001143296, %v256_v8 }
 0x24e   :  { %v247_v11 = vmul.f32 %v246_v9, %v244_v5  ;;  %v258_v13 = vmul.f32 %v257_v10, %v244_v5  ;;  %v586_v10 = vmov 5  }
 0x24f   :  { %518 = vset.pattern.permute.xlu0 %v586_v10 }
 0x250   :  { %v259_v14 = vadd.f32 0.014752088, %v258_v13  ;;  %v248_v15 = vadd.f32 0.0036580483, %v247_v11  ;;  %v587_v11 = vmov 4  }
 0x251   :  { %517 = vset.pattern.permute.xlu2 %v587_v11 }
 0x252   :  { %v260_v17 = vmul.f32 %v259_v14, %v244_v5  ;;  %v249_v19 = vmul.f32 %v248_v15, %v244_v5 }
 0x254   :  { %v261_v18 = vadd.f32 0.112945676, %v260_v17  ;;  %v250_v22 = vadd.f32 0.05243302, %v249_v19 }
 0x256   :  { %v262_v20 = vmul.f32 %v261_v18, %v244_v5  ;;  %v251_v25 = vmul.f32 %v250_v22, %v244_v5 }
 0x258   :  { %v263_v21 = vadd.f32 0.4994258, %v262_v20  ;;  %v252_v26 = vadd.f32 0.18741608, %v251_v25 }
 0x25a   :  { %v264_v23 = vmul.f32 %v263_v21, %v244_v5  ;;  %v253_v28 = vmul.f32 %v252_v26, %v244_v5 }
 0x25c   :  { %v265_v24 = vadd.f32 1.0, %v264_v23  ;;  %v254_v32 = vadd.f32 1.1283791, %v253_v28 }
 0x25e   :  { %521 = vrcp.f32 %v265_v24  ;;  %v277_v31 = vand.u32 2147483648, %v265_v24  ;;  %v275_v34 = vand.u32 2147483647, %v265_v24  ;;  %vm271_vm11 = vweird.f32 %v265_v24 }
 0x25f   :  { %v255_v37 = vmul.f32 %v254_v32, %v242_v2 }
 0x260   :  { %v278_v36 = vor.u32 1.1754944e-38, %v277_v31  ;;  %vm276_vm13 = vcmp.eq.f32.partialorder %v275_v34, 8.507059e+37 }
 0x264   :  { %v522_v27 = vpop.eup %521 }
 0x265   :  { %v267_v29 = vmul.f32 %v522_v27, %v265_v24  ;;  %vm272_vm10 = vweird.f32 %v522_v27 }
 0x266   :  { %vm273_vm12 = vmor %vm271_vm11, %vm272_vm10 }
 0x267   :  { %v268_v30 = vsub.f32 1.0, %v267_v29 }
 0x269   :  { %v269_v33 = vmul.f32 %v522_v27, %v268_v30 }
 0x26b   :  { %v270_v35 = vadd.f32 %v522_v27, %v269_v33 }
 0x26d   :  { %v274_v38 = vsel %vm273_vm12, %v522_v27, %v270_v35 }
 0x26e   :  { %v279_v39 = vsel %vm276_vm13, %v278_v36, %v274_v38 }
 0x26f   :  { %v280_v40 = vmul.f32 %v279_v39, %v255_v37 }
 0x271   :  { %v492_v41 = vclamps-f32 %v280_v40, 1.0 }
 0x273   :  { %v283_v43 = vadd.f32 1.0, %v492_v41 }
 0x275   :  { %v284_v44 = vmul.f32 %v283_v43, %v241_v42 }
 0x277   :  { %285 = vrot.lane.b32.xlu0 %v284_v44, %s581_s28  ;;  %288 = vrot.lane.b32.xlu2 %v284_v44, %s580_s27 }
 0x278   :  { %335 = vmatpush.msrb.mxu2 %v284_v44 }
 0x279   :  { %496 = vmatmul.msk.f32.vlgmr.msrb.gmra.mxu2 %vm203_vm9, %v493_v45 }
 0x27f   :  { %461 = vperm.xlu0 %518, %v635_v3   ;;  %456 = vperm.xlu2 %517, %v635_v3  }
 0x2d1   :  { %v289_v48 = vpop.permute.xlu2 %288 }
 0x2d2   :  { %498 = vmatpush.msk.msrb.mxu3 %vm638_vm3, %v289_v48 }
 0x2d3   :  { %499 = vmatmul.msk.f32.vlgmr.msrb.gmra.mxu3 %vm203_vm9, %v497_v47 }
 0x2d9   :  { %v457_v31 = vpop.permute.xlu2 %456 }
 0x2e9   :  { %v286_v50 = vpop.permute.xlu0 %285 }
 0x2ea   :  { %494 = vmatpush.msk.msrb.mxu1 %vm649_vm4, %v286_v50 }
 0x2eb   :  { %495 = vmatmul.msk.f32.vlgmr.msrb.gmra.mxu1 %vm203_vm9, %v293_v49 }
 0x2ec   :  { %446 = vmatpush.msra.mxu1 %v660_v16 }
 0x2f1   :  { %v462_v33 = vpop.permute.xlu0 %461 }
 0x2fc   :  { %v337_v51 = vpop.f32.mrf.mxu2 }
 0x356   :  { %v362_v53 = vpop.f32.mrf.mxu3 }
 0x368   :  { %v314_v52 = vpop.f32.mrf.mxu1 }
 0x369   :  { %v338_v54 = vadd.f32 %v337_v51, %v314_v52 }
 0x36b   :  { %v365_v55 = vadd.f32 %v362_v53, %v338_v54 }
 0x36d   :  { %v370_v56 = vadd.f32 %v368_v7, %v365_v55 }
 0x36f   :  { %v371_v57 = vrot.slane %v370_v56, 4  ;;  %v377_v58 = vmul.f32 %v370_v56, %v370_v56 }
 0x371   :  { %v372_v59 = vadd.f32 %v371_v57, %v370_v56  ;;  %v378_v60 = vrot.slane %v377_v58, 4 }
 0x373   :  { %v373_v61 = vrot.slane %v372_v59, 2  ;;  %v379_v62 = vadd.f32 %v378_v60, %v377_v58 }
 0x375   :  { %v374_v63 = vadd.f32 %v373_v61, %v372_v59  ;;  %v380_v12 = vrot.slane %v379_v62, 2 }
 0x377   :  { %v375_v0 = vrot.slane %v374_v63, 1  ;;  %v381_v1 = vadd.f32 %v380_v12, %v379_v62 }
 0x379   :  { %v382_v2 = vrot.slane %v381_v1, 1  ;;  %v376_v4 = vadd.f32 %v375_v0, %v374_v63 }
 0x37b   :  { %v383_v16 = vadd.f32 %v382_v2, %v381_v1 }
 0x37d   :  { %v384_v5 = vsel %vm158_vm5, %v376_v4, %v383_v16 }
 0x37e   :  { %401 = vmatmul.f32.vlgmr.msra.gmra.mxu0 %v384_v5 }
 0x3fb   :  { %v402_v6 = vpop.f32.mrf.mxu0 }
 0x3fc   :  { %v405_v8 = vmul.f32 0.0078125, %v402_v6 }
 0x3fe   :  { %v406_v9 = vmul.f32 %v405_v8, %v405_v8  ;;  %v422_v24 = vsub.f32 0.0, %v405_v8 }
 0x400   :  { %v408_v13 = vrot.slane %v406_v9, 7 }
 0x402   :  { %v410_v14 = vsub.f32 %v405_v8, %v408_v13 }
 0x404   :  { %v411_v15 = vadd.f32 1e-05, %v410_v14 }
 0x406   :  { %523 = vrsqrt.f32 %v411_v15  ;;  %vm418_vm15 = vweird.f32 %v411_v15 }
 0x40c   :  { %v524_v17 = vpop.eup %523 }
 0x40d   :  { %v413_v18 = vmul.f32 %v524_v17, %v411_v15  ;;  %vm419_vm14 = vweird.f32 %v524_v17 }
 0x40e   :  { %vm420_vm0 = vmor %vm418_vm15, %vm419_vm14 }
 0x40f   :  { %v414_v19 = vmul.f32 %v524_v17, %v413_v18 }
 0x411   :  { %v415_v20 = vmul.f32 0.5, %v414_v19 }
 0x413   :  { %v416_v21 = vsub.f32 1.5, %v415_v20 }
 0x415   :  { %v417_v22 = vmul.f32 %v524_v17, %v416_v21 }
 0x417   :  { %v421_v23 = vsel %vm420_vm0, %v524_v17, %v417_v22 }
 0x418   :  { %v424_v25 = vrot.slane %v421_v23, 1 }
 0x41a   :  { %v426_v26 = vmul.f32 %v424_v25, %v422_v24 }
 0x41c   :  { %v427_v27 = vsel %vm158_vm5, %v426_v26, %v421_v23 }
 0x41d   :  { %500 = vmatmul.msk.f32.vlgmr.msra.gmra.mxu1 %vm203_vm9, %v427_v27 }
 0x49a   :  { %v448_v3 = vpop.f32.mrf.mxu1 }
 0x49b   :  { %v451_v28 = vperm.slane %v448_v3, 1  ;;  %v453_v30 = vperm.slane %v448_v3, 0 }
 0x49d   :  { %v452_v29 = vmul.f32 %v451_v28, %v370_v56 }
 0x49f   :  { %v454_v32 = vadd.f32 %v453_v30, %v452_v29 }
 0x4a1   :  { %v459_v34 = vmul.f32 %v457_v31, %v454_v32 }
 0x4a3   :  { %v464_v35 = vadd.f32 %v462_v33, %v459_v34 }
 0x4a5   :  { %465 = vst [vmem:[#allocation5] sm:$0xff] %v464_v35 }
 0x4a6   :  { %476 = dma.vmem_to_hbm [thread:$0]  %s472_s14, 128, %s474_s17, [#allocation4]  }
 0x4a7   :  { %575 = dma.done.wait [#allocation4], 128  }
 0x4a8   :  { %576 = vsyncadd [#allocation4], 4294967168 }
 0x4a9   :  { %481 = vsyncpa [#allocation3], 1 }
 0x4aa   :  { %482 = vsyncpa [#allocation4], 1 }

</bundles_post_ra>
